<compile_context>
chip_gen: v7x
topology: tpu7x:2x2x1
jax: 0.10.0
libtpu: 0.0.40
codegen_flags: <defaults>
</compile_context>

<pallas_src>
from collections.abc import Sequence
from functools import partial

import jax
import jax.numpy as jnp
from jax.experimental import pallas as pl
from jax.experimental.pallas import tpu as pltpu


# ----------------------------- fused Pallas kernel --------------------------

def _fused_affine_clip_kernel(x_ref, scale_ref, offset_ref, bounds_ref, o_ref,
                              *, tile_r, do_clip):
    """o = clip(x * scale + offset, lo, hi) on a (tile_r, tile_c) slab tile.

    scale_ref / offset_ref are grid-resident (padded_rows, 1) columns (their
    block index is constant across the whole grid, so they're DMA'd into VMEM
    exactly once); the row window for the current tile is sliced in-kernel.
    Clip bounds live in SMEM so runtime-varying bounds do not recompile.
    All math in f32 (v5e has no bf16 VPU path); cast back at the store.
    """
    r0 = pl.multiple_of(pl.program_id(0) * tile_r, tile_r)
    s = scale_ref[pl.ds(r0, tile_r), :]        # (tile_r, 1), lane-broadcast
    o = offset_ref[pl.ds(r0, tile_r), :]
    y = x_ref[...].astype(jnp.float32) * s + o
    if do_clip:
        y = jnp.clip(y, bounds_ref[0], bounds_ref[1])
    o_ref[...] = y.astype(o_ref.dtype)


# --------------------------- tiling / VMEM policy ----------------------------

def _vmem_limit_bytes():
    """Per-generation scoped-VMEM limit (explicit, with headroom for compiler
    scratch and the resident scale/offset columns)."""
    try:
        cap = pltpu.get_tpu_info().vmem_capacity_bytes
    except Exception:  # pragma: no cover - conservative fallback (v7x per-TC)
        cap = 64 << 20
    return int(min(cap * 3 // 4, 100 << 20))


def _choose_tiles(rows, cols, in_dtype, out_dtype, tile_budget):
    """Pick (tile_r, tile_c) so the double-buffered in+out working set fits
    `tile_budget`, tile_r is aligned to the dtype's sublane packing, tile_c is
    a multiple of 128 (lane-dense stores) and the grid has >= 2 steps so both
    v7x TensorCores get work (harmless no-op on v5e/v6e)."""
    in_b = jnp.dtype(in_dtype).itemsize
    out_b = jnp.dtype(out_dtype).itemsize
    per_elem = 2 * (in_b + out_b)              # 2 pipeline buffers, in + out
    align_r = 8 * max(1, 4 // in_b)            # 8 f32 / 16 bf16 / 32 int8

    if cols % 128 != 0:
        # TODO(synk): pad cols host-side to a multiple of 128 for fully
        # lane-dense stores; a full-dim lane block keeps correctness here.
        tile_c = cols
    else:
        tile_c = (min(cols, 16384) // 128) * 128
        while tile_c > 128 and align_r * tile_c * per_elem > tile_budget:
            tile_c //= 2
        tile_c = max(128, (tile_c // 128) * 128)

    tile_r = min(rows, max(align_r, tile_budget // (tile_c * per_elem)))
    if tile_r >= align_r:
        tile_r = (tile_r // align_r) * align_r
    tile_r = max(tile_r, 1)

    # Megacore: guarantee at least two grid steps for v7x's two TensorCores.
    if pl.cdiv(rows, tile_r) * pl.cdiv(cols, tile_c) < 2:
        if tile_r > align_r:
            tile_r = max(align_r, ((tile_r // 2) // align_r) * align_r)
        elif cols % 128 == 0 and tile_c > 128:
            tile_c = max(128, ((tile_c // 2) // 128) * 128)
    return tile_r, tile_c


def _apply_fused(x, scale_c, offset_c, clip_bounds, *, out_dtype=None,
                 donate=False):
    """Run the fused per-channel FMA (+ optional clip) as one pallas_call."""
    n, c, h, w = x.shape
    rows, cols = n * c, h * w
    slab = x.reshape(rows, cols)

    if out_dtype is None:
        # Normalize/Affine on integer images must stay floating point.
        out_dtype = (x.dtype if jnp.issubdtype(x.dtype, jnp.floating)
                     else jnp.float32)

    vmem_limit = _vmem_limit_bytes()
    tile_r, tile_c = _choose_tiles(rows, cols, slab.dtype, out_dtype,
                                   tile_budget=vmem_limit * 2 // 3)
    grid = (pl.cdiv(rows, tile_r), pl.cdiv(cols, tile_c))
    padded_rows = grid[0] * tile_r

    # Per-row (= per-channel, batch-repeated) constants, padded to the grid so
    # the in-kernel dynamic row slice never runs past the buffer.  These are
    # grid-resident: constant block index -> DMA'd into VMEM once.
    scale_col = jnp.tile(jnp.asarray(scale_c, jnp.float32), n)
    offset_col = jnp.tile(jnp.asarray(offset_c, jnp.float32), n)
    if padded_rows != rows:
        scale_col = jnp.pad(scale_col, (0, padded_rows - rows))
        offset_col = jnp.pad(offset_col, (0, padded_rows - rows))
    scale_col = scale_col.reshape(padded_rows, 1)
    offset_col = offset_col.reshape(padded_rows, 1)

    do_clip = clip_bounds is not None
    lo, hi = clip_bounds if do_clip else (0.0, 0.0)
    bounds = jnp.asarray([lo, hi], jnp.float32)   # SMEM scalars, no recompile

    aliases = {}
    if donate and slab.dtype == jnp.dtype(out_dtype):
        aliases = {0: 0}      # reuse x's HBM buffer for the output

    out = pl.pallas_call(
        partial(_fused_affine_clip_kernel, tile_r=tile_r, do_clip=do_clip),
        out_shape=jax.ShapeDtypeStruct((rows, cols), out_dtype),
        grid=grid,
        in_specs=[
            pl.BlockSpec((tile_r, tile_c), lambda i, j: (i, j)),
            pl.BlockSpec((padded_rows, 1), lambda i, j: (0, 0)),   # resident
            pl.BlockSpec((padded_rows, 1), lambda i, j: (0, 0)),   # resident
            pl.BlockSpec(memory_space=pltpu.MemorySpace.SMEM),
        ],
        out_specs=pl.BlockSpec((tile_r, tile_c), lambda i, j: (i, j)),
        compiler_params=pltpu.CompilerParams(
            dimension_semantics=("parallel", "parallel"),
            vmem_limit_bytes=vmem_limit),
        input_output_aliases=aliases,
    )(slab, scale_col, offset_col, bounds)
    return out.reshape(n, c, h, w)


# --------------------------- transform callables ----------------------------

class _ChannelAffine:
    """Base for transforms expressible as per-channel y = x*scale_c + offset_c."""

    def channel_scale_offset(self, num_channels):
        raise NotImplementedError

    def __call__(self, x):
        # Standalone fallback: single fused call, no clip.
        s, o = self.channel_scale_offset(x.shape[1])
        return _apply_fused(x, s, o, None)


class Normalize(_ChannelAffine):
    """Per-channel (x - mean) / std, channels along NCHW axis 1."""

    def __init__(self, mean, std):
        self.mean = jnp.asarray(mean, jnp.float32)  # (C,)
        self.std = jnp.asarray(std, jnp.float32)    # (C,)

    def channel_scale_offset(self, num_channels):
        inv_std = 1.0 / self.std
        return inv_std, -self.mean * inv_std


class Affine(_ChannelAffine):
    """x * scale + shift with scalar constants."""

    def __init__(self, scale, shift):
        self.scale = float(scale)
        self.shift = float(shift)

    def channel_scale_offset(self, num_channels):
        return (jnp.full((num_channels,), self.scale, jnp.float32),
                jnp.full((num_channels,), self.shift, jnp.float32))


class Clip:
    """clamp(x, lo, hi)."""

    def __init__(self, lo, hi):
        self.lo = float(lo)
        self.hi = float(hi)

    def __call__(self, x):
        c = x.shape[1]
        return _apply_fused(x, jnp.ones((c,), jnp.float32),
                            jnp.zeros((c,), jnp.float32),
                            (self.lo, self.hi), out_dtype=x.dtype)


# ------------------------------- Compose ------------------------------------

class Compose:
    """JAX/Pallas port of arskl Compose: apply transforms sequentially.

    Runs of channel-affine transforms (Normalize/Affine), optionally followed
    by a Clip, are algebraically folded and executed as a single fused Pallas
    kernel.  Any other callable is applied as-is, preserving the original
    sequential semantics.  NOTE: the fold computes (x*s + o) in one f32 FMA
    instead of sequential divide-then-affine; rounding differs by < 1e-5.
    """

    def __init__(self, transforms):
        assert isinstance(transforms, Sequence)
        self.transforms = []
        for transform in transforms:
            if callable(transform):
                self.transforms.append(transform)
            else:
                raise TypeError(
                    f"transform must be callable, but got {type(transform)}")

    def __call__(self, x):
        ts = self.transforms
        i = 0
        while i < len(ts):
            t = ts[i]
            if isinstance(t, _ChannelAffine):
                c = x.shape[1]
                scale = jnp.ones((c,), jnp.float32)
                offset = jnp.zeros((c,), jnp.float32)
                # Fold the maximal run of affine-like transforms:
                #   y = (x*s_prev + o_prev)*s_i + o_i
                while i < len(ts) and isinstance(ts[i], _ChannelAffine):
                    s_i, o_i = ts[i].channel_scale_offset(c)
                    scale = scale * s_i
                    offset = offset * s_i + o_i
                    i += 1
                clip_bounds = None
                if i < len(ts) and isinstance(ts[i], Clip):
                    clip_bounds = (ts[i].lo, ts[i].hi)
                    i += 1
                x = _apply_fused(x, scale, offset, clip_bounds)
            else:
                x = t(x)
                i += 1
        return x


# --------------------------------- main --------------------------------------

if __name__ == "__main__":
    key = jax.random.PRNGKey(0)
    N, C, H, W = 2, 4, 16, 16
    x = jax.random.normal(key, (N, C, H, W), dtype=jnp.float32)

    # Deterministic parameters (shapes implied by the per-channel transform).
    mean = jnp.arange(C, dtype=jnp.float32) * 0.1          # (C,)
    std = jnp.arange(1, C + 1, dtype=jnp.float32) * 0.5    # (C,)

    pipeline = Compose([
        Normalize(mean, std),
        Affine(scale=2.0, shift=-0.25),
        Clip(lo=-1.0, hi=1.0),
    ])

    out = pipeline(x)
    out = jax.block_until_ready(out)

    # Reference check (plain JAX), same sequential semantics.
    ref = (x - mean.reshape(1, C, 1, 1)) / std.reshape(1, C, 1, 1)
    ref = ref * 2.0 - 0.25
    ref = jnp.clip(ref, -1.0, 1.0)
    assert out.shape == (N, C, H, W)
    assert out.dtype == x.dtype
    assert jnp.allclose(out, ref, atol=1e-5, rtol=1e-5)

    print("KERNEL_OK")
</pallas_src>

<mosaic_0001>
module attributes {stable_mosaic.version = 11 : i64} {
  func.func @_fused_affine_clip_kernel(%arg0: i32, %arg1: i32, %arg2: memref<8x128xf32, #tpu.memory_space<vmem>>, %arg3: memref<8x1xf32, #tpu.memory_space<vmem>>, %arg4: memref<8x1xf32, #tpu.memory_space<vmem>>, %arg5: memref<2xf32, #tpu.memory_space<smem>>, %arg6: memref<8x128xf32, #tpu.memory_space<vmem>>) attributes {dimension_semantics = [#tpu.dimension_semantics<parallel>, #tpu.dimension_semantics<parallel>], iteration_bounds = array<i64: 1, 2>, scalar_prefetch = 0 : i64, scratch_operands = 0 : i64, tpu.core_type = #tpu.core_type<tc>, window_params = [{transform_indices = @transform_0, window_bounds = array<i64: 8, 128>}, {pipeline_mode = #tpu.pipeline_mode<synchronous>, transform_indices = @transform_1, window_bounds = array<i64: 8, 1>}, {pipeline_mode = #tpu.pipeline_mode<synchronous>, transform_indices = @transform_2, window_bounds = array<i64: 8, 1>}, {transform_indices = @transform_3, window_bounds = array<i64: 2>}, {transform_indices = @transform_4, window_bounds = array<i64: 8, 128>}]} {
    %c8_i32 = arith.constant 8 : i32
    %0 = arith.muli %arg0, %c8_i32 : i32
    %1 = tpu.assume_multiple %0, 8 : i32
    %2 = arith.index_cast %1 : i32 to index
    %c0 = arith.constant 0 : index
    %3 = vector.load %arg3[%2, %c0] : memref<8x1xf32, #tpu.memory_space<vmem>>, vector<8x1xf32>
    %4 = arith.index_cast %1 : i32 to index
    %c0_0 = arith.constant 0 : index
    %5 = vector.load %arg4[%4, %c0_0] : memref<8x1xf32, #tpu.memory_space<vmem>>, vector<8x1xf32>
    %c0_1 = arith.constant 0 : index
    %c0_2 = arith.constant 0 : index
    %6 = vector.load %arg2[%c0_1, %c0_2] : memref<8x128xf32, #tpu.memory_space<vmem>>, vector<8x128xf32>
    %7 = vector.broadcast %3 : vector<8x1xf32> to vector<8x128xf32>
    %8 = arith.mulf %6, %7 : vector<8x128xf32>
    %9 = vector.broadcast %5 : vector<8x1xf32> to vector<8x128xf32>
    %10 = arith.addf %8, %9 : vector<8x128xf32>
    %c0_3 = arith.constant 0 : index
    %11 = memref.load %arg5[%c0_3] : memref<2xf32, #tpu.memory_space<smem>>
    %c1 = arith.constant 1 : index
    %12 = memref.load %arg5[%c1] : memref<2xf32, #tpu.memory_space<smem>>
    %13 = vector.broadcast %11 : f32 to vector<8x128xf32>
    %14 = arith.maximumf %13, %10 : vector<8x128xf32>
    %15 = vector.broadcast %12 : f32 to vector<8x128xf32>
    %16 = arith.minimumf %15, %14 : vector<8x128xf32>
    %c0_4 = arith.constant 0 : index
    %c0_5 = arith.constant 0 : index
    %17 = vector.load %arg6[%c0_4, %c0_5] : memref<8x128xf32, #tpu.memory_space<vmem>>, vector<8x128xf32>
    tpu.vector_store %arg6[%c0_4, %c0_5], %16 {strides = array<i32>} : memref<8x128xf32, #tpu.memory_space<vmem>>, vector<8x128xf32>,
    return
  }
  func.func @transform_0(%arg0: i32, %arg1: i32) -> (i32, i32) {
    %c0_i32 = arith.constant 0 : i32
    return %arg0, %arg1 : i32, i32
  }
  func.func @transform_1(%arg0: i32, %arg1: i32) -> (i32, i32) {
    %c0_i32 = arith.constant 0 : i32
    %c0_i32_0 = arith.constant 0 : i32
    %c0_i32_1 = arith.constant 0 : i32
    return %c0_i32, %c0_i32_0 : i32, i32
  }
  func.func @transform_2(%arg0: i32, %arg1: i32) -> (i32, i32) {
    %c0_i32 = arith.constant 0 : i32
    %c0_i32_0 = arith.constant 0 : i32
    %c0_i32_1 = arith.constant 0 : i32
    return %c0_i32, %c0_i32_0 : i32, i32
  }
  func.func @transform_3(%arg0: i32, %arg1: i32) -> i32 {
    %c0_i32 = arith.constant 0 : i32
    %c0_i32_0 = arith.constant 0 : i32
    return %c0_i32 : i32
  }
  func.func @transform_4(%arg0: i32, %arg1: i32) -> (i32, i32) {
    %c0_i32 = arith.constant 0 : i32
    return %arg0, %arg1 : i32, i32
  }
}

</mosaic_0001>

<bundles_post_ra>
// kernel: tpu_custom_call.1
= control target key start
LH: loop header
LB: loop body
LE: loop exit
PB: predicated region body
PF: predicated region fallthrough
CT: control target
= control target key end

     0   :  { %9 = vsyncpa [#allocation4], 0  ;;  %s715_s0 = inlined_call_operand.vmem [shape: f32[8,256], index: 0, kind: input, shape index: {}]   ;;  %s716_s1 = inlined_call_operand.vmem [shape: f32[8,1], index: 1, kind: input, shape index: {}]   ;;  %s717_s2 = inlined_call_operand.vmem [shape: f32[8,1], index: 2, kind: input, shape index: {}]   ;;  %s718_s3 = inlined_call_operand.vmem [shape: f32[2], index: 3, kind: input, shape index: {}]   ;;  %s719_s4 = inlined_call_operand.hbm [shape: f32[8,256], index: 4, kind: output, shape index: {}]  }
   0x1   :  { %10 = vsyncpa [#allocation3], 0 }
   0x2   :  { %12 = vsyncpa [#allocation3 + $0x1], 0  ;;  %s576_s15 = smov 0   ;;  %s578_s16 = smov 0  }
   0x3   :  { %s580_s17 = smov 0   ;;  %s582_s18 = smov 0  }
   0x4   :  { %s584_s19 = smov 0   ;;  %s586_s20 = smov 0  }
   0x5 LB: > { %s367_s21 = sadd.s32 4294967295, %s546_s20   ;;  %s368_s22 = sadd.s32 4294967294, %s546_s20   ;;  %s546_s20 = sphi %s586_s20, %s18_s20   ;;  %s542_s19 = sphi %s584_s19, %s728_s19   ;;  %s538_s18 = sphi %s582_s18, %s727_s18   ;;  %s534_s17 = sphi %s580_s17, %s726_s17   ;;  %s530_s16 = sphi %s578_s16, %s725_s16   ;;  %s526_s15 = sphi %s576_s15, %s724_s15  }
   0x6   : > { %s27_s23 = sadd.s32 1, %s542_s19  ;;  %s130_s24 = sadd.s32 1, %s534_s17 }
   0x7   : > { %p28_p0 = scmp.ge.s32.totalorder %s27_s23, 2  ;;  %p140_p1 = scmp.ne.s32.totalorder %s534_s17, %s530_s16 }
   0x8   : > { %p141_p2 = scmp.eq.s32.totalorder %s367_s21, 1  ;;  %p146_p3 = scmp.ne.s32.totalorder %s530_s16, %s526_s15 }
   0x9   : > { %s730_s23 = smov (%p28_p0, %s27_s23), 0  ;;  %p147_p5 = scmp.eq.s32.totalorder %s368_s22, 1 }
   0xa   : > { %p616_p4 = por %p141_p2, %p140_p1  ;;  %s126_s26 = ssub.s32 %s542_s19, %s730_s23 }
   0xb   : > { %p369_p6 = scmp.ge.s32.totalorder %s546_s20, 1  ;;  %p128_p7 = scmp.eq.s32.totalorder %s126_s26, 0 }
   0xc   : > { %p623_p8 = por %p147_p5, %p146_p3  ;;  %p154_p9 = scmp.lt.s32.totalorder %s546_s20, 3 }
   0xd   : > { %s629_s28 = scalar_select %p128_p7, %s534_s17, %s130_s24  }
   0xe   : > { %p631_p10 = pnand %p369_p6, %p154_p9  ;;  %p635_p11 = scmp.eq.s32.totalorder %s367_s21, 0 }
   0xf   : > { %s173_s7 = sshll.u32 %s718_s3, 4  ;;  %s174_s7 = int_to_ptr.vmem [resolvable:$true] %s173_s7 }
  0x10   : > { %p387_p12 = pneg %p631_p10  ;;  %s449_s8 = scalar_lea.vmem %s174_s7, 16 }
  0x11   : > { %p450_p0 = scmp.ne.s32.totalorder %s174_s7, %s449_s8  ;;  %p457_p5 = scmp.lt.s32.totalorder %s174_s7, %s174_s7 }
  0x12   : > { %p388_p13 = pnand %p635_p11, %p387_p12  ;;  %p458_p6 = scmp.lt.s32.totalorder %s449_s8, %s449_s8 }
  0x14   : > { %p451_p1 = pneg %p388_p13  ;;  %p459_p7 = por %p458_p6, %p457_p5 }
  0x16   : > { %p452_p2 = pnand %p451_p1, %p450_p0 }
  0x18   : > { %p453_p3 = pneg %p452_p2 }
  0x1a   : > { %p460_p9 = pnand %p459_p7, %p453_p3 }
  0x1c   : > { %463 = shalt.err (!%p460_p9)
}
  0x1d   : > { %s548_s9 = smov [#allocation2]   ;;  %197 = sbr.rel (%p631_p10) target bundleno = 193 (0xc1), region = 36 }
  0x1e   : > { %390 = dma.vmem_to_smem (!%p388_p13), %s174_s7, 16, %s548_s9, [#allocation4]  }
  0x24   : > { %517 = dma.done.wait (%p635_p11), [#allocation4], 16  }
  0x25   : > { %519 = vsyncadd (%p635_p11), [#allocation4], 4294967280 }
  0x26   : > { %203 = sfence }
  0x27   : > { %v237_v0 = vld [vmem:[%s716_s1] sm:$0xff]  ;;  %v549_v1 = vmov 0   ;;  %p229_p10 = scmp.lt.s32.totalorder %s538_s18, 1  ;;  %s253_s22 = sld [smem:[#allocation2]] }
  0x28   : > { %448 = vset.pattern.permute.xlu0 %v549_v1  ;;  %v239_v2 = vld [vmem:[%s717_s2] sm:$0xff]  ;;  %s224_s30 = sand.u32 1, %s530_s16   ;;  %s376_s5 = sld [smem:[#allocation2 + $0x1]] }
  0x29   : > { %243 = vperm.xlu0 %448, %v237_v0   ;;  %s230_s14 = scalar_select %p229_p10, %s538_s18, 1 }
  0x2a   : > { %s374_s6 = sshll.u32 %s224_s30, 3  ;;  %s378_s7 = sshll.u32 %s538_s18, 7 }
  0x2b   : > { %s375_s21 = sshll.u32 %s230_s14, 3  ;;  %s226_s8 = scalar_lea.vmem [#allocation5], %s374_s6 }
  0x2c   : > { %s234_s29 = scalar_lea.vmem %s715_s0, %s375_s21  ;;  %s276_s9 = sshll.u32 %s226_s8, 4  ;;  %s670_s9 = int_to_ptr.vmem [resolvable:$true] %s276_s9 }
  0x2d   : > { %249 = vperm.xlu0 %448, %v239_v2   ;;  %v240_v4 = vld [vmem:[%s234_s29] sm:$0xff]  ;;  %v255_v6 = vstv %s253_s22  ;;  %s668_s12 = scalar_lea.hbm %s719_s4, %s378_s7  ;;  %s261_s13 = scalar_lea.sflag [#allocation3], %s224_s30 }
  0x2e   : > { %v257_v9 = vstv %s376_s5  ;;  %s464_s14 = scalar_lea.vmem %s670_s9, 128  ;;  %s550_s18 = smov [#allocation5]  }
  0x2f   : > { %p465_p11 = scmp.ne.s32.totalorder %s670_s9, %s464_s14  ;;  %s468_s21 = sshll.u32 %s550_s18, 4  ;;  %s469_s21 = int_to_ptr.vmem [resolvable:$false] %s468_s21 }
  0x30   : > { %s470_s22 = scalar_lea.vmem %s469_s21, 256  ;;  %p471_p0 = scmp.lt.s32.totalorder %s670_s9, %s469_s21 }
  0x31   : > { %p466_p12 = pnand %p465_p11, %p616_p4  ;;  %p472_p1 = scmp.lt.s32.totalorder %s470_s22, %s464_s14 }
  0x33   : > { %p467_p13 = pneg %p466_p12  ;;  %p473_p2 = por %p472_p1, %p471_p0 }
  0x35   : > { %p474_p3 = pnand %p473_p2, %p467_p13 }
  0xa8   : > { %v244_v3 = vpop.permute.xlu0 %243 }
  0xa9   : > { %v246_v5 = vmul.f32 %v244_v3, %v240_v4 }
  0xac   : > { %v250_v7 = vpop.permute.xlu0 %249 }
  0xad   : > { %v252_v8 = vadd.f32 %v250_v7, %v246_v5 }
  0xaf   : > { %v256_v10 = vmax.f32 %v255_v6, %v252_v8 }
  0xb1   : > { %v258_v11 = vmin.f32 %v257_v9, %v256_v10 }
  0xb3   : > { %259 = vst [vmem:[%s226_s8] sm:$0xff] %v258_v11 }
  0xb4   : > { %477 = shalt.err (!%p474_p3)
}
  0xb5   : > { %s478_s24 = scalar_lea.hbm %s668_s12, 128  ;;  %s482_s30 = scalar_lea.hbm %s719_s4, 256 }
  0xb6   : > { %p479_p5 = scmp.ne.s32.totalorder %s668_s12, %s478_s24  ;;  %p483_p9 = scmp.lt.u32.totalorder %s668_s12, %s719_s4 }
  0xb7   : > { %p484_p10 = scmp.lt.u32.totalorder %s482_s30, %s478_s24  ;;  %p486_p12 = scmp.lt.u32.totalorder %s478_s24, %s668_s12 }
  0xb8   : > { %p480_p6 = pnand %p479_p5, %p616_p4 }
  0xb9   : > { %p485_p11 = por %p484_p10, %p483_p9 }
  0xba   : > { %p481_p7 = pneg %p480_p6 }
  0xbb   : > { %p487_p13 = por %p486_p12, %p485_p11 }
  0xbd   : > { %p488_p0 = pnand %p487_p13, %p481_p7 }
  0xbf   : > { %491 = shalt.err (!%p488_p0)
}
  0xc0   : > { %385 = dma.vmem_to_hbm [thread:$0]  (%p616_p4), %s670_s9, 128, %s668_s12, %s261_s13  }
  0xc1 PF: > { %p397_p1 = scmp.ge.s32.totalorder %s546_s20, 2  ;;  %s288_s7 = sand.u32 1, %s526_s15  }
  0xc2   : > { %s289_s8 = scalar_lea.sflag [#allocation3], %s288_s7 }
  0xc3   : > { %p392_p2 = pnand %p397_p1, %p623_p8 }
  0xc5   : > { %521 = dma.done.wait (!%p392_p2), %s289_s8, 128  }
  0xc6   : > { %523 = vsyncadd (!%p392_p2), %s289_s8, 4294967168  ;;  %s18_s20 = sadd.s32 1, %s546_s20   ;;  %s724_s15 = smov %s530_s16 }
  0xc7   : > { %p15_p3 = scmp.ge.s32.totalorder %s18_s20, 4   ;;  %s725_s16 = smov %s534_s17 }
  0xc8   : > { %s726_s17 = smov %s629_s28  ;;  %s727_s18 = smov %s542_s19 }
  0xc9   : > { %s728_s19 = smov %s730_s23  ;;  %17 = sbr.rel (!%p15_p3) target bundleno = 5 (0x5), region = 78 }
  0xd0   :  { %294 = vsyncpa [#allocation3], 1 }
  0xd1   :  { %296 = vsyncpa [#allocation3 + $0x1], 1 }
  0xd2   :  { %297 = vsyncpa [#allocation4], 1 }
  0xd3   :  { %299 = vsyncpa [#allocation4 + $0x1], 1 }

</bundles_post_ra>
